<compile_context>
chip_gen: v7x
topology: tpu7x:2x2x1
jax: 0.10.0
libtpu: 0.0.40
codegen_flags: <defaults>
</compile_context>

<pallas_src>
import math
import functools

import jax
import jax.numpy as jnp
from jax import lax
from jax.experimental import pallas as pl
from jax.experimental.pallas import tpu as pltpu


# ---------------------------------------------------------------------------
# Tiled matmul + bias:  out[M, N] = x[M, K] @ w[K, N] + b[1, N]
# ---------------------------------------------------------------------------
def _matmul_bias_kernel(x_ref, w_ref, b_ref, o_ref, acc_ref):
    k = pl.program_id(2)

    @pl.when(k == 0)
    def _init():
        acc_ref[...] = jnp.zeros_like(acc_ref)

    acc_ref[...] += jnp.dot(x_ref[...], w_ref[...],
                            preferred_element_type=jnp.float32)

    @pl.when(k == pl.num_programs(2) - 1)
    def _finalize():
        o_ref[...] = (acc_ref[...] + b_ref[...]).astype(o_ref.dtype)


def _pick_tile(dim, target):
    """Largest power-of-two-ish tile <= target that divides dim (or dim itself)."""
    if dim <= target:
        return dim
    t = target
    while t >= 8:
        if dim % t == 0:
            return t
        t //= 2
    return dim


def _matmul_bias(x, w, b, *, out_dtype, bm=256, bn=256, bk=256):
    M, K = x.shape
    K2, N = w.shape
    assert K == K2
    bm = _pick_tile(M, bm)
    bn = _pick_tile(N, bn)
    bk = _pick_tile(K, bk)
    b2 = b.reshape(1, N).astype(jnp.float32)

    return pl.pallas_call(
        _matmul_bias_kernel,
        out_shape=jax.ShapeDtypeStruct((M, N), out_dtype),
        grid_spec=pltpu.PrefetchScalarGridSpec(
            num_scalar_prefetch=0,
            grid=(M // bm, N // bn, K // bk),
            in_specs=[
                pl.BlockSpec((bm, bk), lambda i, j, k: (i, k)),
                pl.BlockSpec((bk, bn), lambda i, j, k: (k, j)),
                pl.BlockSpec((1, bn), lambda i, j, k: (0, j)),
            ],
            out_specs=pl.BlockSpec((bm, bn), lambda i, j, k: (i, j)),
            scratch_shapes=[pltpu.VMEM((bm, bn), jnp.float32)],
        ),
        compiler_params=pltpu.CompilerParams(
            dimension_semantics=("parallel", "parallel", "arbitrary")),
    )(x, w, b2)


# ---------------------------------------------------------------------------
# Flash attention (causal, online softmax).  q/k/v: (B, H, T, hd)
# ---------------------------------------------------------------------------
def _flash_attn_kernel(q_ref, k_ref, v_ref, o_ref, m_sc, l_sc, acc_sc, *,
                       scale, block_q, block_k):
    qi = pl.program_id(2)
    ki = pl.program_id(3)
    nk = pl.num_programs(3)

    @pl.when(ki == 0)
    def _init():
        m_sc[...] = jnp.full_like(m_sc, -jnp.inf)
        l_sc[...] = jnp.zeros_like(l_sc)
        acc_sc[...] = jnp.zeros_like(acc_sc)

    # Causal tile skip: kv tiles strictly above the diagonal contribute nothing.
    @pl.when(ki <= qi)
    def _compute():
        # Fold 1/sqrt(hd) into the (bq, hd) q tile, not the (bq, bk) scores.
        q = q_ref[0, 0] * jnp.asarray(scale, q_ref.dtype)
        k = k_ref[0, 0]
        v = v_ref[0, 0]

        # MXU: (bq, hd) x (hd, bk) -> fp32 scores.
        # TODO(synk): for hd < 128 the MXU contraction is under-utilized; pack
        # multiple heads / pad hd to 128 for higher MXU occupancy.
        s = jnp.dot(q, k.T, preferred_element_type=jnp.float32)

        # Tile-local causal mask from global positions (only the diagonal tile
        # is partially masked; off-diagonal computed tiles are fully valid).
        q_pos = qi * block_q + lax.broadcasted_iota(jnp.int32, (block_q, block_k), 0)
        k_pos = ki * block_k + lax.broadcasted_iota(jnp.int32, (block_q, block_k), 1)
        s = jnp.where(q_pos >= k_pos, s, -jnp.inf)

        m_prev = m_sc[...]
        m_new = jnp.maximum(m_prev, jnp.max(s, axis=-1, keepdims=True))
        alpha = jnp.exp(m_prev - m_new)
        p = jnp.exp(s - m_new)                    # unnormalized probs (fp32)

        l_sc[...] = alpha * l_sc[...] + jnp.sum(p, axis=-1, keepdims=True)
        acc_sc[...] = alpha * acc_sc[...] + jnp.dot(
            p.astype(v.dtype), v, preferred_element_type=jnp.float32)
        m_sc[...] = m_new

    @pl.when(ki == nk - 1)
    def _finalize():
        # Deferred normalization: one (bq, hd) multiply by an EUP reciprocal.
        inv_l = pl.reciprocal(l_sc[...], approx=True)
        o_ref[0, 0] = (acc_sc[...] * inv_l).astype(o_ref.dtype)


def _flash_attention(q, k, v, *, scale, block_q=128):
    B, H, T, hd = q.shape
    blk = _pick_tile(T, block_q)          # block_q == block_k (diagonal tile == qi)
    nq = T // blk
    nk = T // blk

    kernel = functools.partial(_flash_attn_kernel, scale=scale,
                               block_q=blk, block_k=blk)

    def q_map(b, h, qi, ki):
        return (b, h, qi, 0)

    def kv_map(b, h, qi, ki):
        # Clamp kv tiles above the diagonal back to the diagonal tile so the
        # pipeline re-uses the already-resident block (no wasted DMA).
        return (b, h, jnp.minimum(ki, qi), 0)

    return pl.pallas_call(
        kernel,
        out_shape=jax.ShapeDtypeStruct((B, H, T, hd), q.dtype),
        grid_spec=pltpu.PrefetchScalarGridSpec(
            num_scalar_prefetch=0,
            grid=(B, H, nq, nk),
            in_specs=[
                pl.BlockSpec((1, 1, blk, hd), q_map),
                pl.BlockSpec((1, 1, blk, hd), kv_map),
                pl.BlockSpec((1, 1, blk, hd), kv_map),
            ],
            out_specs=pl.BlockSpec((1, 1, blk, hd), q_map),
            scratch_shapes=[
                pltpu.VMEM((blk, 1), jnp.float32),   # running max m
                pltpu.VMEM((blk, 1), jnp.float32),   # running denom l
                pltpu.VMEM((blk, hd), jnp.float32),  # unnormalized output acc
            ],
        ),
        compiler_params=pltpu.CompilerParams(
            dimension_semantics=("parallel", "parallel", "parallel", "arbitrary")),
    )(q, k, v)


# ---------------------------------------------------------------------------
# Full module forward
# ---------------------------------------------------------------------------
def causal_self_attention(x, w_qkv, b_qkv, w_proj, b_proj, *, n_head,
                          compute_dtype=jnp.bfloat16,
                          block_q=128, block_mm=256):
    """x: (B, T, C); returns (B, T, C) in x.dtype.  Matches 因果自注意力模块.forward."""
    B, T, C = x.shape
    assert C % n_head == 0
    hd = C // n_head
    cd = compute_dtype

    # --- QKV projection (tiled matmul, bf16 inputs, fp32 accumulate) ---
    x2 = x.reshape(B * T, C).astype(cd)
    qkv = _matmul_bias(x2, w_qkv.astype(cd), b_qkv, out_dtype=cd,
                       bm=block_mm, bn=block_mm, bk=block_mm)      # (B*T, 3C)
    qkv = qkv.reshape(B, T, 3 * C)
    q, k, v = qkv[..., :C], qkv[..., C:2 * C], qkv[..., 2 * C:]

    def split_heads(t):                                            # (B, H, T, hd)
        return t.reshape(B, T, n_head, hd).transpose(0, 2, 1, 3)

    q, k, v = split_heads(q), split_heads(k), split_heads(v)

    # --- Flash attention (causal, batched over (B, H) via the grid) ---
    y = _flash_attention(q, k, v, scale=1.0 / math.sqrt(hd), block_q=block_q)

    # --- Merge heads + output projection ---
    y = y.transpose(0, 2, 1, 3).reshape(B * T, C)
    out = _matmul_bias(y, w_proj.astype(cd), b_proj, out_dtype=x.dtype,
                       bm=block_mm, bn=block_mm, bk=block_mm)
    return out.reshape(B, T, C)


# ---------------------------------------------------------------------------
# Pure-JAX fp32 reference (matches the PyTorch forward pass)
# ---------------------------------------------------------------------------
def reference(x, w_qkv, b_qkv, w_proj, b_proj, *, n_head):
    B, T, C = x.shape
    hd = C // n_head
    qkv = x @ w_qkv + b_qkv
    q, k, v = jnp.split(qkv, 3, axis=2)
    q = q.reshape(B, T, n_head, hd).transpose(0, 2, 1, 3)
    k = k.reshape(B, T, n_head, hd).transpose(0, 2, 1, 3)
    v = v.reshape(B, T, n_head, hd).transpose(0, 2, 1, 3)
    att = (q @ k.transpose(0, 1, 3, 2)) * (1.0 / math.sqrt(hd))
    mask = jnp.tril(jnp.ones((T, T), dtype=bool))
    att = jnp.where(mask[None, None], att, float("-inf"))
    att = jax.nn.softmax(att, axis=-1)
    y = att @ v
    y = y.transpose(0, 2, 1, 3).reshape(B, T, C)
    return y @ w_proj + b_proj


if __name__ == "__main__":
    # Small config consistent with the module: 嵌长 % 头数 == 0
    B, T, C, H = 2, 8, 32, 4

    key = jax.random.PRNGKey(0)
    kx, k1, k2, k3, k4 = jax.random.split(key, 5)

    x = jax.random.normal(kx, (B, T, C), dtype=jnp.float32)
    w_qkv = jax.random.normal(k1, (C, 3 * C), dtype=jnp.float32) * 0.02
    b_qkv = jax.random.normal(k2, (3 * C,), dtype=jnp.float32) * 0.02
    w_proj = jax.random.normal(k3, (C, C), dtype=jnp.float32) * 0.02
    b_proj = jax.random.normal(k4, (C,), dtype=jnp.float32) * 0.02

    out = causal_self_attention(x, w_qkv, b_qkv, w_proj, b_proj, n_head=H)
    out = jax.block_until_ready(out)

    ref = reference(x, w_qkv, b_qkv, w_proj, b_proj, n_head=H)
    assert out.shape == (B, T, C)
    # bf16 matmul inputs (fp32 accumulation / fp32 softmax) -> loosened tolerance.
    assert jnp.allclose(out.astype(jnp.float32), ref, atol=2e-2, rtol=2e-2), \
        "mismatch vs reference"

    print("KERNEL_OK")
</pallas_src>

<mosaic_0001>
module attributes {stable_mosaic.version = 11 : i64} {
  func.func @_matmul_bias_kernel(%arg0: i32, %arg1: i32, %arg2: i32, %arg3: memref<16x32xbf16, #tpu.memory_space<vmem>>, %arg4: memref<32x96xbf16, #tpu.memory_space<vmem>>, %arg5: memref<1x96xf32, #tpu.memory_space<vmem>>, %arg6: memref<16x96xbf16, #tpu.memory_space<vmem>>, %arg7: memref<16x96xf32, #tpu.memory_space<vmem>>) attributes {dimension_semantics = [#tpu.dimension_semantics<parallel>, #tpu.dimension_semantics<parallel>, #tpu.dimension_semantics<arbitrary>], iteration_bounds = array<i64: 1, 1, 1>, scalar_prefetch = 0 : i64, scratch_operands = 1 : i64, tpu.core_type = #tpu.core_type<tc>, window_params = [{transform_indices = @transform_0, window_bounds = array<i64: 16, 32>}, {transform_indices = @transform_1, window_bounds = array<i64: 32, 96>}, {transform_indices = @transform_2, window_bounds = array<i64: 1, 96>}, {transform_indices = @transform_3, window_bounds = array<i64: 16, 96>}]} {
    %c0_i32 = arith.constant 0 : i32
    %0 = arith.cmpi eq, %arg2, %c0_i32 : i32
    %1 = arith.extui %0 : i1 to i32
    %c0_i32_0 = arith.constant 0 : i32
    %2 = arith.cmpi ne, %1, %c0_i32_0 : i32
    scf.if %2 {
      %cst_10 = arith.constant 0.000000e+00 : f32
      %12 = vector.broadcast %cst_10 : f32 to vector<16x96xf32>
      %c0_11 = arith.constant 0 : index
      %c0_12 = arith.constant 0 : index
      %13 = vector.load %arg7[%c0_11, %c0_12] : memref<16x96xf32, #tpu.memory_space<vmem>>, vector<16x96xf32>
      tpu.vector_store %arg7[%c0_11, %c0_12], %12 {strides = array<i32>} : memref<16x96xf32, #tpu.memory_space<vmem>>, vector<16x96xf32>,
    } else {
    }
    %c0 = arith.constant 0 : index
    %c0_1 = arith.constant 0 : index
    %3 = vector.load %arg7[%c0, %c0_1] : memref<16x96xf32, #tpu.memory_space<vmem>>, vector<16x96xf32>
    %c0_2 = arith.constant 0 : index
    %c0_3 = arith.constant 0 : index
    %4 = vector.load %arg3[%c0_2, %c0_3] : memref<16x32xbf16, #tpu.memory_space<vmem>>, vector<16x32xbf16>
    %c0_4 = arith.constant 0 : index
    %c0_5 = arith.constant 0 : index
    %5 = vector.load %arg4[%c0_4, %c0_5] : memref<32x96xbf16, #tpu.memory_space<vmem>>, vector<32x96xbf16>
    %cst = arith.constant dense<0.000000e+00> : vector<16x96xf32>
    %6 = tpu.matmul %4, %5, %cst {dimension_numbers = #tpu.dot_dimension_numbers<[1], [0], [0], [1], [0, 0, 1, 1], [], []>} : vector<16x32xbf16>, vector<32x96xbf16>, vector<16x96xf32> -> vector<16x96xf32>
    %7 = arith.addf %3, %6 : vector<16x96xf32>
    %c0_6 = arith.constant 0 : index
    %c0_7 = arith.constant 0 : index
    %8 = vector.load %arg7[%c0_6, %c0_7] : memref<16x96xf32, #tpu.memory_space<vmem>>, vector<16x96xf32>
    tpu.vector_store %arg7[%c0_6, %c0_7], %7 {strides = array<i32>} : memref<16x96xf32, #tpu.memory_space<vmem>>, vector<16x96xf32>,
    %c0_i32_8 = arith.constant 0 : i32
    %9 = arith.cmpi eq, %arg2, %c0_i32_8 : i32
    %10 = arith.extui %9 : i1 to i32
    %c0_i32_9 = arith.constant 0 : i32
    %11 = arith.cmpi ne, %10, %c0_i32_9 : i32
    scf.if %11 {
      %c0_10 = arith.constant 0 : index
      %c0_11 = arith.constant 0 : index
      %12 = vector.load %arg7[%c0_10, %c0_11] : memref<16x96xf32, #tpu.memory_space<vmem>>, vector<16x96xf32>
      %c0_12 = arith.constant 0 : index
      %c0_13 = arith.constant 0 : index
      %13 = vector.load %arg5[%c0_12, %c0_13] : memref<1x96xf32, #tpu.memory_space<vmem>>, vector<1x96xf32>
      %14 = vector.broadcast %13 : vector<1x96xf32> to vector<16x96xf32>
      %15 = arith.addf %12, %14 : vector<16x96xf32>
      %16 = arith.truncf %15 : vector<16x96xf32> to vector<16x96xbf16>
      %c0_14 = arith.constant 0 : index
      %c0_15 = arith.constant 0 : index
      %17 = vector.load %arg6[%c0_14, %c0_15] : memref<16x96xbf16, #tpu.memory_space<vmem>>, vector<16x96xbf16>
      tpu.vector_store %arg6[%c0_14, %c0_15], %16 {strides = array<i32>} : memref<16x96xbf16, #tpu.memory_space<vmem>>, vector<16x96xbf16>,
    } else {
    }
    return
  }
  func.func @transform_0(%arg0: i32, %arg1: i32, %arg2: i32) -> (i32, i32) {
    %c0_i32 = arith.constant 0 : i32
    return %arg0, %arg2 : i32, i32
  }
  func.func @transform_1(%arg0: i32, %arg1: i32, %arg2: i32) -> (i32, i32) {
    %c0_i32 = arith.constant 0 : i32
    return %arg2, %arg1 : i32, i32
  }
  func.func @transform_2(%arg0: i32, %arg1: i32, %arg2: i32) -> (i32, i32) {
    %c0_i32 = arith.constant 0 : i32
    %c0_i32_0 = arith.constant 0 : i32
    return %c0_i32, %arg1 : i32, i32
  }
  func.func @transform_3(%arg0: i32, %arg1: i32, %arg2: i32) -> (i32, i32) {
    %c0_i32 = arith.constant 0 : i32
    return %arg0, %arg1 : i32, i32
  }
}

</mosaic_0001>

<bundles_post_ra>
// kernel: tpu_custom_call.1
= control target key start
LH: loop header
LB: loop body
LE: loop exit
PB: predicated region body
PF: predicated region fallthrough
CT: control target
= control target key end

     0   :  { %8 = vsyncpa [#allocation4], 0  ;;  %s350_s0 = inlined_call_operand.hbm [shape: bf16[16,32], index: 0, kind: input, shape index: {}]   ;;  %s351_s1 = inlined_call_operand.hbm [shape: bf16[32,96], index: 1, kind: input, shape index: {}]   ;;  %s352_s2 = inlined_call_operand.vmem [shape: f32[1,96], index: 2, kind: input, shape index: {}]   ;;  %s353_s3 = inlined_call_operand.hbm [shape: bf16[16,96], index: 3, kind: output, shape index: {}]  }
   0x1   :  { %9 = vsyncpa [#allocation7], 0 }
   0x2   :  { %10 = vsyncpa [#allocation5], 0  ;;  %s271_s12 = smov [#allocation3]   ;;  %s199_s16 = scalar_lea.hbm %s350_s0, 128 }
   0x3   :  { %s16_s13 = sshll.u32 %s271_s12, 4  ;;  %p200_p0 = scmp.ne.s32.totalorder %s350_s0, %s199_s16  ;;  %s17_s13 = int_to_ptr.vmem [resolvable:$true] %s16_s13 }
   0x4   :  { %p203_p1 = scmp.lt.u32.totalorder %s199_s16, %s350_s0 }
   0x6   :  { %p205_p2 = pnand %p203_p1, %p200_p0 }
   0x8   :  { %208 = shalt.err (!%p205_p2)
}
   0x9   :  { %s209_s21 = scalar_lea.vmem %s17_s13, 128  ;;  %p214_p4 = scmp.lt.s32.totalorder %s17_s13, %s17_s13 }
   0xa   :  { %p210_p3 = scmp.ne.s32.totalorder %s17_s13, %s209_s21  ;;  %p215_p5 = scmp.lt.s32.totalorder %s209_s21, %s209_s21 }
   0xc   :  { %p216_p6 = por %p215_p5, %p214_p4 }
   0xe   :  { %p217_p7 = pnand %p216_p6, %p210_p3 }
  0x10   :  { %220 = shalt.err (!%p217_p7)
}
  0x11   :  { %s272_s22 = smov 64   ;;  %s273_s23 = smov 4  }
  0x12   :  { %22 = dma.hbm_to_vmem [thread:$0]  %s350_s0, 128, %s17_s13, [#allocation4], %s272_s22, %s272_s22, %s273_s23  }
  0x13   :  { %s274_s26 = smov [#allocation6]   ;;  %s221_s30 = scalar_lea.hbm %s351_s1, 256 }
  0x14   :  { %s28_s27 = sshll.u32 %s274_s26, 4  ;;  %p222_p8 = scmp.ne.s32.totalorder %s351_s1, %s221_s30  ;;  %s29_s27 = int_to_ptr.vmem [resolvable:$true] %s28_s27 }
  0x15   :  { %p225_p9 = scmp.lt.u32.totalorder %s221_s30, %s351_s1 }
  0x17   :  { %p227_p10 = pnand %p225_p9, %p222_p8 }
  0x19   :  { %230 = shalt.err (!%p227_p10)
}
  0x1a   :  { %s231_s8 = scalar_lea.vmem %s29_s27, 256  ;;  %p236_p12 = scmp.lt.s32.totalorder %s29_s27, %s29_s27 }
  0x1b   :  { %p232_p11 = scmp.ne.s32.totalorder %s29_s27, %s231_s8  ;;  %p237_p13 = scmp.lt.s32.totalorder %s231_s8, %s231_s8 }
  0x1d   :  { %p238_p0 = por %p237_p13, %p236_p12 }
  0x1f   :  { %p239_p1 = pnand %p238_p0, %p232_p11 }
  0x21   :  { %242 = shalt.err (!%p239_p1)
}
  0x22   :  { %34 = dma.hbm_to_vmem [thread:$0]  %s351_s1, 256, %s29_s27, [#allocation7], %s272_s22, %s272_s22, %s273_s23  }
  0x23   :  { %265 = dma.done.wait [#allocation4], 128  }
  0x24   :  { %266 = vsyncadd [#allocation4], 4294967168 }
  0x25   :  { %267 = dma.done.wait [#allocation7], 256  }
  0x26   :  { %268 = vsyncadd [#allocation7], 4294967040  ;;  %vm48_vm0 = vcmask 785408   ;;  %v275_v0 = vmov 0.0   ;;  %vm276_vm1 = vmmov 0   ;;  %v196_v1 = vld [vmem:[#allocation6] sm:$0xff]  }
  0x27   :  { %49 = vst.msk [vmem:[#allocation2] sm:$0xff] %vm48_vm0, %v275_v0  ;;  %50 = vst.msk [vmem:[#allocation2 + $0x8] sm:$0xff] %vm48_vm0, %v275_v0  ;;  %181 = vmatprep.subr.bf16.mxu0 %v275_v0  ;;  %185 = vmatprep.mubr.msk.bf16.mxu0 %vm276_vm1, %v275_v0  ;;  %v197_v2 = vld [vmem:[#allocation6 + $0x8] sm:$0xff]   ;;  %v198_v3 = vld [vmem:[#allocation3] sm:$0xff]   ;;  %vm76_vm2 = vcmask 261120   ;;  %vm148_vm3 = vcmask 781312  }
  0x28   :  { %182 = vmatpush3.bf16.msra.mxu0 %v196_v1  ;;  %v173_v12 = vld [vmem:[%s352_s2] ss:$0 sm:$0xff]  ;;  %s277_s11 = smov [#allocation8]  }
  0x29   :  { %183 = vmatprep.subr.bf16.mxu0 %v275_v0  ;;  %s156_s12 = sshll.u32 %s277_s11, 4  ;;  %s157_s12 = int_to_ptr.vmem [resolvable:$true] %s156_s12 }
  0x2a   :  { %s243_s13 = scalar_lea.vmem %s157_s12, 128  ;;  %p248_p3 = scmp.lt.s32.totalorder %s157_s12, %s157_s12 }
  0x2b   :  { %p244_p2 = scmp.ne.s32.totalorder %s157_s12, %s243_s13  ;;  %p249_p4 = scmp.lt.s32.totalorder %s243_s13, %s243_s13 }
  0x2c   :  { %184 = vmatpush3.bf16.msra.mxu0 %v197_v2 }
  0x2d   :  { %p250_p5 = por %p249_p4, %p248_p3 }
  0x2e   :  { %v51_v4 = vld [vmem:[#allocation2] sm:$0xff]  ;;  %v52_v6 = vld [vmem:[#allocation2 + $0x8] sm:$0xff] }
  0x2f   :  { %186 = vmatmul.mubr.msk.bf16.vlgmr.msra.gmra.mrb[0].mxu0 %vm76_vm2, %v198_v3  ;;  %p251_p6 = pnand %p250_p5, %p244_p2 }
 0x102   :  { %v114_v5 = vpop.f32.mrb[0].mxu0 }
 0x103   :  { %v121_v7 = vadd.f32 %v114_v5, %v51_v4  ;;  %v187_v8 = vpop.f32.mrb[1].mxu0 }
 0x104   :  { %v117_v9 = vpop.f32.mrb[2].mxu0 }
 0x105   :  { %124 = vst.msk [vmem:[#allocation2] sm:$0xff] %vm48_vm0, %v121_v7  ;;  %v122_v10 = vadd.f32 %v117_v9, %v52_v6  ;;  %v188_v11 = vpop.f32.mrb[3].mxu0 }
 0x107   :  { %125 = vst.msk [vmem:[#allocation2 + $0x8] sm:$0xff] %vm48_vm0, %v122_v10 }
 0x10c   :  { %v129_v13 = vld [vmem:[#allocation2] sm:$0xff] }
 0x10d   :  { %v138_v14 = vadd.f32 %v173_v12, %v129_v13 }
 0x10e   :  { %v130_v15 = vld [vmem:[#allocation2 + $0x8] sm:$0xff] }
 0x10f   :  { %v139_v16 = vadd.f32 %v173_v12, %v130_v15  ;;  %v176_v17 = vpack.c.bf16 %v138_v14, %v138_v14 }
 0x111   :  { %v177_v18 = vpack.c.bf16 %v139_v16, %v139_v16  ;;  %149 = vst.msk [vmem:[#allocation8] sm:$0xf] %vm148_vm3, %v176_v17 }
 0x113   :  { %150 = vst.msk [vmem:[#allocation8 + $0x4] sm:$0xf] %vm148_vm3, %v177_v18 }
 0x114   :  { %254 = shalt.err (!%p251_p6)
}
 0x115   :  { %s255_s15 = scalar_lea.hbm %s353_s3, 128 }
 0x116   :  { %p256_p7 = scmp.ne.s32.totalorder %s353_s3, %s255_s15  ;;  %p259_p8 = scmp.lt.u32.totalorder %s255_s15, %s353_s3 }
 0x118   :  { %p261_p9 = pnand %p259_p8, %p256_p7 }
 0x11a   :  { %264 = shalt.err (!%p261_p9)
}
 0x11b   :  { %162 = dma.vmem_to_hbm [thread:$0]  %s157_s12, 128, %s353_s3, [#allocation5], %s272_s22, %s272_s22, %s273_s23  }
 0x11c   :  { %269 = dma.done.wait [#allocation5], 128  }
 0x11d   :  { %270 = vsyncadd [#allocation5], 4294967168 }
 0x11e   :  { %166 = vsyncpa [#allocation4], 1 }
 0x11f   :  { %167 = vsyncpa [#allocation7], 1 }
 0x120   :  { %168 = vsyncpa [#allocation5], 1 }

</bundles_post_ra>
